<compile_context>
chip_gen: v5e
topology: v5e:2x2
jax: 0.10.0
libtpu: 0.0.40
codegen_flags: <defaults>
</compile_context>

<pallas_src>
import functools
import math

import jax
import jax.numpy as jnp
from jax import lax
from jax.experimental import pallas as pl
from jax.experimental.pallas import tpu as pltpu


def _round_up(x, m):
    return -(-x // m) * m


def _apply_act(x, af):
    if af == "tanh":
        return jnp.tanh(x)
    if af == "relu":
        return jnp.maximum(x, 0.0)
    return x  # af is None / '' -> identity


# ---------------------------------------------------------------------------
# Path A: small vocab — table VMEM-resident, one-hot gather on the MXU.
# ---------------------------------------------------------------------------
def _onehot_kernel(idx_ref, table_ref, o_ref, *, af):
    # idx_ref:   (TB, 1) int32   token ids for this token block
    # table_ref: (V, D)          full embedding table (resident; fetched once)
    # o_ref:     (TB, D)
    idx = idx_ref[...]                                   # (TB, 1)
    tb = idx.shape[0]
    v = table_ref.shape[0]
    # onehot[t, j] = (j == idx[t]); out-of-range ids -> all-zero row -> act(0).
    col = lax.broadcasted_iota(jnp.int32, (tb, v), 1)
    onehot = (col == idx).astype(table_ref.dtype)        # (TB, V)
    emb = jnp.dot(onehot, table_ref[...],
                  preferred_element_type=jnp.float32)    # (TB, D) row copy
    o_ref[...] = _apply_act(emb, af).astype(o_ref.dtype)


def _embedding_onehot(flat_ids, table, *, af, block_tokens):
    n_pad = flat_ids.shape[0]
    V, D = table.shape
    nblk = n_pad // block_tokens
    itemsize = jnp.dtype(table.dtype).itemsize
    cost = pl.CostEstimate(
        flops=2 * n_pad * V * D,
        transcendentals=(n_pad * D if af == "tanh" else 0),
        # Table is VMEM-resident: counted once, not once per token block.
        bytes_accessed=V * D * itemsize + n_pad * 4 + n_pad * D * itemsize,
    )
    return pl.pallas_call(
        functools.partial(_onehot_kernel, af=af),
        out_shape=jax.ShapeDtypeStruct((n_pad, D), table.dtype),
        grid_spec=pltpu.PrefetchScalarGridSpec(
            num_scalar_prefetch=0,
            grid=(nblk,),
            in_specs=[
                pl.BlockSpec((block_tokens, 1), lambda i: (i, 0)),
                pl.BlockSpec((V, D), lambda i: (0, 0)),   # constant -> resident
            ],
            out_specs=pl.BlockSpec((block_tokens, D), lambda i: (i, 0)),
        ),
        compiler_params=pltpu.CompilerParams(
            dimension_semantics=("parallel",),            # megacore-shardable
        ),
        cost_estimate=cost,
    )(flat_ids.reshape(n_pad, 1), table)


# ---------------------------------------------------------------------------
# Path B: large vocab — table stays in HBM, scalar-prefetched ids, DMA gather.
# ---------------------------------------------------------------------------
def _gather_kernel(ids_ref, table_hbm, o_ref, buf, sem, *, af, block_tokens):
    # ids_ref:   SMEM (n_pad,) int32  all token ids (scalar-prefetched)
    # table_hbm: (V, D) in HBM (pl.ANY) — rows DMA'd on demand
    # o_ref:     (TB, D) output block
    # buf:       (TB, D) VMEM gather buffer
    # sem:       DMA semaphores (2,) — two rows in flight (double buffer)
    base = pl.program_id(0) * block_tokens

    def start_row(t, slot):
        tok = ids_ref[base + t]
        pltpu.make_async_copy(table_hbm.at[tok], buf.at[t], sem.at[slot]).start()

    start_row(0, 0)

    def body(t, carry):
        slot = lax.rem(t, 2)

        @pl.when(t + 1 < block_tokens)
        def _():
            start_row(t + 1, 1 - slot)

        # Wait for row t (descriptor has the same shape as the started copy).
        pltpu.make_async_copy(table_hbm.at[0], buf.at[t], sem.at[slot]).wait()
        return carry

    lax.fori_loop(0, block_tokens, body, 0)
    o_ref[...] = _apply_act(buf[...], af).astype(o_ref.dtype)


def _embedding_gather(flat_ids, table, *, af, block_tokens):
    n_pad = flat_ids.shape[0]
    V, D = table.shape
    nblk = n_pad // block_tokens
    itemsize = jnp.dtype(table.dtype).itemsize
    cost = pl.CostEstimate(
        flops=0,
        transcendentals=(n_pad * D if af == "tanh" else 0),
        bytes_accessed=n_pad * D * itemsize + n_pad * 4 + n_pad * D * itemsize,
    )
    return pl.pallas_call(
        functools.partial(_gather_kernel, af=af, block_tokens=block_tokens),
        out_shape=jax.ShapeDtypeStruct((n_pad, D), table.dtype),
        grid_spec=pltpu.PrefetchScalarGridSpec(
            num_scalar_prefetch=1,                         # ids -> SMEM
            grid=(nblk,),
            in_specs=[pl.BlockSpec(memory_space=pl.ANY)],  # table stays in HBM
            out_specs=pl.BlockSpec((block_tokens, D), lambda i, ids: (i, 0)),
            scratch_shapes=[
                pltpu.VMEM((block_tokens, D), table.dtype),
                pltpu.SemaphoreType.DMA((2,)),
            ],
        ),
        compiler_params=pltpu.CompilerParams(
            dimension_semantics=("parallel",),
        ),
        cost_estimate=cost,
    )(flat_ids, table)


# ---------------------------------------------------------------------------
# Wrapper: method selection, token-block clamping, VMEM budget guard.
# ---------------------------------------------------------------------------
_RESIDENT_TABLE_BYTES = 4 * 1024 * 1024   # keep table VMEM-resident below this
_RESIDENT_TABLE_ROWS = 4096               # cap the (TB, V) one-hot temporary
_VMEM_BUDGET_BYTES = 12 * 1024 * 1024     # fits v5e's 16 MiB scoped default


def my_embedding_pallas(indices, table, *, af="tanh", method="auto",
                        block_tokens=None):
    """out = act(table[indices]); indices: int[...], table: [V, D] -> [..., D]."""
    V, D = table.shape
    in_shape = indices.shape
    n = math.prod(in_shape)
    itemsize = jnp.dtype(table.dtype).itemsize
    table_bytes = V * D * itemsize

    if method == "auto":
        # Small table -> VMEM-resident one-hot MXU gather (exact row copy).
        # Large table -> O(n*D) DMA row gather (one-hot would be O(n*V*D)).
        method = ("onehot"
                  if table_bytes <= _RESIDENT_TABLE_BYTES and V <= _RESIDENT_TABLE_ROWS
                  else "gather")

    if block_tokens is None:
        # Clamp token block to the workload (M only needs a multiple of 8 for
        # f32 sublanes); cap at 512 so big batches still yield >=2 parallel
        # blocks for v7x megacore.
        block_tokens = max(8, min(512, _round_up(n, 8)))

    # Conservative VMEM-footprint guard: shrink the token block rather than OOM.
    def _vmem_estimate(tb):
        if method == "onehot":
            return (2 * table_bytes + 2 * tb * D * itemsize
                    + tb * V * 4 + tb * D * 4 + 2 * tb * 4)
        return 3 * tb * D * itemsize + 2 * tb * 4

    while block_tokens > 8 and _vmem_estimate(block_tokens) > _VMEM_BUDGET_BYTES:
        block_tokens = max(8, (block_tokens // 2) // 8 * 8)

    n_pad = _round_up(n, block_tokens)
    flat = indices.reshape(-1).astype(jnp.int32)
    if n_pad != n:
        flat = jnp.pad(flat, (0, n_pad - n))   # padded ids hit row 0, sliced off

    if method == "onehot":
        out = _embedding_onehot(flat, table, af=af, block_tokens=block_tokens)
    else:
        # Clip so padded / out-of-range ids never issue an OOB row DMA.
        out = _embedding_gather(jnp.clip(flat, 0, V - 1), table,
                                af=af, block_tokens=block_tokens)

    if n_pad != n:
        out = out[:n]
    return out.reshape(*in_shape, D)


if __name__ == "__main__":
    key = jax.random.PRNGKey(0)
    k_tab, k_idx = jax.random.split(key)

    # Synthetic "vocab_list": 512 entries; embedding dim 128; batch=2, seq=8.
    VOCAB, DIM = 512, 128
    B, S = 2, 8

    # torch.nn.init.normal_(weight, 0.0, 0.1)
    table = 0.1 * jax.random.normal(k_tab, (VOCAB, DIM), dtype=jnp.float32)
    indices = jax.random.randint(k_idx, (B, S), 0, VOCAB, dtype=jnp.int32)

    ref_tanh = jnp.tanh(table[indices])
    ref_relu = jnp.maximum(table[indices], 0.0)

    # Path A (auto-selected at this size): resident-table one-hot MXU gather.
    out = jax.block_until_ready(my_embedding_pallas(indices, table, af="tanh"))
    assert out.shape == (B, S, DIM)
    assert jnp.allclose(out, ref_tanh, atol=1e-5, rtol=1e-5), "onehot/tanh mismatch"

    out_relu = jax.block_until_ready(my_embedding_pallas(indices, table, af="relu"))
    assert jnp.allclose(out_relu, ref_relu, atol=1e-5, rtol=1e-5), "relu mismatch"

    # Path B (large-vocab DMA row gather), forced here at small shape to verify.
    out_g = jax.block_until_ready(
        my_embedding_pallas(indices, table, af="tanh", method="gather"))
    assert jnp.allclose(out_g, ref_tanh, atol=1e-5, rtol=1e-5), "gather path mismatch"

    print("KERNEL_OK")
</pallas_src>

<mosaic_0001>
module attributes {stable_mosaic.version = 11 : i64} {
  func.func @_onehot_kernel(%arg0: i32, %arg1: memref<16x1xi32, #tpu.memory_space<vmem>>, %arg2: memref<512x128xf32, #tpu.memory_space<vmem>>, %arg3: memref<16x128xf32, #tpu.memory_space<vmem>>) attributes {dimension_semantics = [#tpu.dimension_semantics<parallel>], iteration_bounds = array<i64: 1>, scalar_prefetch = 0 : i64, scratch_operands = 0 : i64, tpu.core_type = #tpu.core_type<tc>, window_params = [{transform_indices = @transform_0, window_bounds = array<i64: 16, 1>}, {pipeline_mode = #tpu.pipeline_mode<synchronous>, transform_indices = @transform_1, window_bounds = array<i64: 512, 128>}, {transform_indices = @transform_2, window_bounds = array<i64: 16, 128>}]} {
    %c0 = arith.constant 0 : index
    %c0_0 = arith.constant 0 : index
    %0 = vector.load %arg1[%c0, %c0_0] : memref<16x1xi32, #tpu.memory_space<vmem>>, vector<16x1xi32>
    %1 = tpu.iota {dimensions = array<i32: 1>} : vector<16x512xi32>
    %2 = vector.broadcast %0 : vector<16x1xi32> to vector<16x512xi32>
    %3 = arith.cmpi eq, %1, %2 : vector<16x512xi32>
    %4 = arith.extui %3 : vector<16x512xi1> to vector<16x512xi32>
    %5 = arith.sitofp %4 : vector<16x512xi32> to vector<16x512xf32>
    %c0_1 = arith.constant 0 : index
    %c0_2 = arith.constant 0 : index
    %6 = vector.load %arg2[%c0_1, %c0_2] : memref<512x128xf32, #tpu.memory_space<vmem>>, vector<512x128xf32>
    %cst = arith.constant dense<0.000000e+00> : vector<16x128xf32>
    %7 = tpu.matmul %5, %6, %cst {dimension_numbers = #tpu.dot_dimension_numbers<[1], [0], [0], [1], [0, 0, 1, 1], [], []>} : vector<16x512xf32>, vector<512x128xf32>, vector<16x128xf32> -> vector<16x128xf32>
    %8 = math.tanh %7 : vector<16x128xf32>
    %c0_3 = arith.constant 0 : index
    %c0_4 = arith.constant 0 : index
    %9 = vector.load %arg3[%c0_3, %c0_4] : memref<16x128xf32, #tpu.memory_space<vmem>>, vector<16x128xf32>
    tpu.vector_store %arg3[%c0_3, %c0_4], %8 {strides = array<i32>} : memref<16x128xf32, #tpu.memory_space<vmem>>, vector<16x128xf32>,
    return
  }
  func.func @transform_0(%arg0: i32) -> (i32, i32) {
    %c0_i32 = arith.constant 0 : i32
    %c0_i32_0 = arith.constant 0 : i32
    return %arg0, %c0_i32 : i32, i32
  }
  func.func @transform_1(%arg0: i32) -> (i32, i32) {
    %c0_i32 = arith.constant 0 : i32
    %c0_i32_0 = arith.constant 0 : i32
    %c0_i32_1 = arith.constant 0 : i32
    return %c0_i32, %c0_i32_0 : i32, i32
  }
  func.func @transform_2(%arg0: i32) -> (i32, i32) {
    %c0_i32 = arith.constant 0 : i32
    %c0_i32_0 = arith.constant 0 : i32
    return %arg0, %c0_i32 : i32, i32
  }
}

</mosaic_0001>

<bundles_post_ra>
// kernel: tpu_custom_call.1
= control target key start
LH: loop header
LB: loop body
LE: loop exit
PB: predicated region body
PF: predicated region fallthrough
CT: control target
= control target key end

     0   :  { %7 = vsyncpa [#allocation3], 0  ;;  %s362_s0 = inlined_call_operand.vmem [shape: s32[16,1], index: 0, kind: input, shape index: {}]   ;;  %s363_s1 = inlined_call_operand.hbm [shape: f32[512,128], index: 1, kind: input, shape index: {}]   ;;  %s364_s2 = inlined_call_operand.hbm [shape: f32[16,128], index: 2, kind: output, shape index: {}]  }
   0x1   :  { %8 = vsyncpa [#allocation4], 0  ;;  %s15_s11 = sshll.u32 %s363_s1, 4  ;;  %s323_s12 = smov [#allocation2]   ;;  %s16_s11 = int_to_ptr.hbm [resolvable:$true] %s15_s11 }
   0x2   :  { %s17_s13 = sshll.u32 %s323_s12, 4  ;;  %s324_s14 = smov 128   ;;  %s18_s13 = int_to_ptr.vmem [resolvable:$true] %s17_s13 }
   0x3   :  { %s325_s15 = smov 8  }
   0x4   :  { %23 = dma.hbm_to_vmem [thread:$0]  %s16_s11, 8192, %s18_s13, [#allocation3], %s324_s14, %s324_s14, %s325_s15  }
   0x5   :  { %319 = dma.done.wait [#allocation3], 8192  }
   0x6   :  { %320 = vsyncadd [#allocation3], 4294959104  ;;  %v326_v0 = vmov 0   ;;  %v28_v1 = vld [vmem:[%s362_s0] sm:$0xff]  ;;  %v80_v2 = vld [vmem:[#allocation2 + $0x78] sm:$0xff]  ;;  %s231_s22 = sshll.u32 %s364_s2, 4  ;;  %s232_s22 = int_to_ptr.hbm [resolvable:$true] %s231_s22 }
   0x7   :  { %266 = vset.pattern.permute.xlu0 %v326_v0  ;;  %129 = vmatpush.msra.mxu0 %v80_v2  ;;  %v96_v3 = vld [vmem:[#allocation2 + $0xf8] sm:$0xff]  ;;  %v79_v6 = vld [vmem:[#allocation2 + $0x70] sm:$0xff]  ;;  %v78_v10 = vld [vmem:[#allocation2 + $0x68] sm:$0xff] }
   0x8   :  { %36 = vperm.xlu0 %266, %v28_v1   ;;  %v112_v4 = vld [vmem:[#allocation2 + $0x178] sm:$0xff]  ;;  %152 = vmatpush.msra.mxu1 %v96_v3  ;;  %v95_v7 = vld [vmem:[#allocation2 + $0xf0] sm:$0xff]  ;;  %v94_v11 = vld [vmem:[#allocation2 + $0xe8] sm:$0xff]  ;;  %v30_v3 = vlaneseq }
   0x9   :  { %v128_v5 = vld [vmem:[#allocation2 + $0x1f8] sm:$0xff]  ;;  %175 = vmatpush.msra.mxu2 %v112_v4  ;;  %v111_v8 = vld [vmem:[#allocation2 + $0x170] sm:$0xff]  ;;  %130 = vmatpush.msra.mxu0 %v79_v6  ;;  %v110_v12 = vld [vmem:[#allocation2 + $0x168] sm:$0xff] }
   0xa   :  { %198 = vmatpush.msra.mxu3 %v128_v5  ;;  %v127_v9 = vld [vmem:[#allocation2 + $0x1f0] sm:$0xff]  ;;  %153 = vmatpush.msra.mxu1 %v95_v7  ;;  %v126_v13 = vld [vmem:[#allocation2 + $0x1e8] sm:$0xff]  ;;  %v77_v14 = vld [vmem:[#allocation2 + $0x60] sm:$0xff]  ;;  %v31_v4 = vand.u32 127, %v30_v3 }
   0xb   :  { %176 = vmatpush.msra.mxu2 %v111_v8  ;;  %131 = vmatpush.msra.mxu0 %v78_v10  ;;  %v93_v15 = vld [vmem:[#allocation2 + $0xe0] sm:$0xff]  ;;  %v29_v17 = vld [vmem:[%s362_s0 + $0x8] sm:$0xff]  ;;  %v76_v19 = vld [vmem:[#allocation2 + $0x58] sm:$0xff]  ;;  %s328_s0 = smov [#allocation5]  }
   0xc   :  { %199 = vmatpush.msra.mxu3 %v127_v9  ;;  %v109_v16 = vld [vmem:[#allocation2 + $0x160] sm:$0xff]  ;;  %154 = vmatpush.msra.mxu1 %v94_v11  ;;  %v92_v20 = vld [vmem:[#allocation2 + $0xd8] sm:$0xff]  ;;  %v75_v23 = vld [vmem:[#allocation2 + $0x50] sm:$0xff]  ;;  %v32_v5 = vadd.s32 128, %v31_v4  ;;  %v33_v6 = vadd.s32 256, %v31_v4  ;;  %v34_v7 = vadd.s32 384, %v31_v4 }
   0xd   :  { %177 = vmatpush.msra.mxu2 %v110_v12  ;;  %v125_v18 = vld [vmem:[#allocation2 + $0x1e0] sm:$0xff]  ;;  %132 = vmatpush.msra.mxu0 %v77_v14  ;;  %v108_v21 = vld [vmem:[#allocation2 + $0x158] sm:$0xff]  ;;  %v91_v24 = vld [vmem:[#allocation2 + $0xd0] sm:$0xff]  ;;  %v327_v9 = vmov 1.0   ;;  %s229_s19 = sshll.u32 %s328_s0, 4  ;;  %s230_s19 = int_to_ptr.vmem [resolvable:$true] %s229_s19 }
   0xe   :  { %200 = vmatpush.msra.mxu3 %v126_v13  ;;  %155 = vmatpush.msra.mxu1 %v93_v15  ;;  %v124_v22 = vld [vmem:[#allocation2 + $0x1d8] sm:$0xff]  ;;  %v107_v25 = vld [vmem:[#allocation2 + $0x150] sm:$0xff]  ;;  %v74_v27 = vld [vmem:[#allocation2 + $0x48] sm:$0xff] }
   0xf   :  { %178 = vmatpush.msra.mxu2 %v109_v16  ;;  %133 = vmatpush.msra.mxu0 %v76_v19  ;;  %v123_v26 = vld [vmem:[#allocation2 + $0x1d0] sm:$0xff]  ;;  %v90_v28 = vld [vmem:[#allocation2 + $0xc8] sm:$0xff]  ;;  %v73_v31 = vld [vmem:[#allocation2 + $0x40] sm:$0xff] }
  0x10   :  { %39 = vperm.xlu0 %266, %v29_v17   ;;  %201 = vmatpush.msra.mxu3 %v125_v18  ;;  %v106_v29 = vld [vmem:[#allocation2 + $0x148] sm:$0xff]  ;;  %v89_v32 = vld [vmem:[#allocation2 + $0xc0] sm:$0xff]  ;;  %v72_v35 = vld [vmem:[#allocation2 + $0x38] sm:$0xff] }
  0x11   :  { %156 = vmatpush.msra.mxu1 %v92_v20  ;;  %179 = vmatpush.msra.mxu2 %v108_v21  ;;  %v122_v30 = vld [vmem:[#allocation2 + $0x1c8] sm:$0xff]  ;;  %v105_v33 = vld [vmem:[#allocation2 + $0x140] sm:$0xff]  ;;  %v88_v36 = vld [vmem:[#allocation2 + $0xb8] sm:$0xff] }
  0x12   :  { %202 = vmatpush.msra.mxu3 %v124_v22  ;;  %134 = vmatpush.msra.mxu0 %v75_v23  ;;  %v121_v34 = vld [vmem:[#allocation2 + $0x1c0] sm:$0xff]  ;;  %v104_v37 = vld [vmem:[#allocation2 + $0x138] sm:$0xff]  ;;  %v71_v39 = vld [vmem:[#allocation2 + $0x30] sm:$0xff] }
  0x13   :  { %157 = vmatpush.msra.mxu1 %v91_v24  ;;  %180 = vmatpush.msra.mxu2 %v107_v25  ;;  %v120_v38 = vld [vmem:[#allocation2 + $0x1b8] sm:$0xff]  ;;  %v87_v40 = vld [vmem:[#allocation2 + $0xb0] sm:$0xff]  ;;  %v70_v43 = vld [vmem:[#allocation2 + $0x28] sm:$0xff] }
  0x14   :  { %203 = vmatpush.msra.mxu3 %v123_v26  ;;  %135 = vmatpush.msra.mxu0 %v74_v27  ;;  %v103_v41 = vld [vmem:[#allocation2 + $0x130] sm:$0xff]  ;;  %v86_v44 = vld [vmem:[#allocation2 + $0xa8] sm:$0xff]  ;;  %v69_v47 = vld [vmem:[#allocation2 + $0x20] sm:$0xff] }
  0x15   :  { %158 = vmatpush.msra.mxu1 %v90_v28  ;;  %181 = vmatpush.msra.mxu2 %v106_v29  ;;  %v119_v42 = vld [vmem:[#allocation2 + $0x1b0] sm:$0xff]  ;;  %v102_v45 = vld [vmem:[#allocation2 + $0x128] sm:$0xff]  ;;  %v85_v48 = vld [vmem:[#allocation2 + $0xa0] sm:$0xff] }
  0x16   :  { %204 = vmatpush.msra.mxu3 %v122_v30  ;;  %136 = vmatpush.msra.mxu0 %v73_v31  ;;  %v118_v46 = vld [vmem:[#allocation2 + $0x1a8] sm:$0xff]  ;;  %v101_v49 = vld [vmem:[#allocation2 + $0x120] sm:$0xff]  ;;  %v68_v51 = vld [vmem:[#allocation2 + $0x18] sm:$0xff] }
  0x17   :  { %159 = vmatpush.msra.mxu1 %v89_v32  ;;  %182 = vmatpush.msra.mxu2 %v105_v33  ;;  %v117_v50 = vld [vmem:[#allocation2 + $0x1a0] sm:$0xff]  ;;  %v84_v52 = vld [vmem:[#allocation2 + $0x98] sm:$0xff]  ;;  %v67_v55 = vld [vmem:[#allocation2 + $0x10] sm:$0xff] }
  0x18   :  { %205 = vmatpush.msra.mxu3 %v121_v34  ;;  %137 = vmatpush.msra.mxu0 %v72_v35  ;;  %v100_v53 = vld [vmem:[#allocation2 + $0x118] sm:$0xff]  ;;  %v83_v56 = vld [vmem:[#allocation2 + $0x90] sm:$0xff]  ;;  %v66_v59 = vld [vmem:[#allocation2 + $0x8] sm:$0xff] }
  0x19   :  { %160 = vmatpush.msra.mxu1 %v88_v36  ;;  %183 = vmatpush.msra.mxu2 %v104_v37  ;;  %v116_v54 = vld [vmem:[#allocation2 + $0x198] sm:$0xff]  ;;  %v99_v57 = vld [vmem:[#allocation2 + $0x110] sm:$0xff]  ;;  %v82_v60 = vld [vmem:[#allocation2 + $0x88] sm:$0xff] }
  0x1a   :  { %206 = vmatpush.msra.mxu3 %v120_v38  ;;  %138 = vmatpush.msra.mxu0 %v71_v39  ;;  %v115_v58 = vld [vmem:[#allocation2 + $0x190] sm:$0xff]  ;;  %v98_v61 = vld [vmem:[#allocation2 + $0x108] sm:$0xff]  ;;  %v65_v63 = vld [vmem:[#allocation2] sm:$0xff] }
  0x1b   :  { %161 = vmatpush.msra.mxu1 %v87_v40  ;;  %184 = vmatpush.msra.mxu2 %v103_v41  ;;  %v114_v62 = vld [vmem:[#allocation2 + $0x188] sm:$0xff]  ;;  %v81_v0 = vld [vmem:[#allocation2 + $0x80] sm:$0xff] }
  0x1c   :  { %207 = vmatpush.msra.mxu3 %v119_v42  ;;  %139 = vmatpush.msra.mxu0 %v70_v43  ;;  %v97_v1 = vld [vmem:[#allocation2 + $0x100] sm:$0xff] }
  0x1d   :  { %162 = vmatpush.msra.mxu1 %v86_v44  ;;  %185 = vmatpush.msra.mxu2 %v102_v45  ;;  %v113_v2 = vld [vmem:[#allocation2 + $0x180] sm:$0xff] }
  0x1e   :  { %208 = vmatpush.msra.mxu3 %v118_v46  ;;  %140 = vmatpush.msra.mxu0 %v69_v47 }
  0x1f   :  { %163 = vmatpush.msra.mxu1 %v85_v48  ;;  %186 = vmatpush.msra.mxu2 %v101_v49 }
  0x20   :  { %209 = vmatpush.msra.mxu3 %v117_v50  ;;  %141 = vmatpush.msra.mxu0 %v68_v51 }
  0x21   :  { %164 = vmatpush.msra.mxu1 %v84_v52  ;;  %187 = vmatpush.msra.mxu2 %v100_v53 }
  0x22   :  { %210 = vmatpush.msra.mxu3 %v116_v54  ;;  %142 = vmatpush.msra.mxu0 %v67_v55 }
  0x23   :  { %165 = vmatpush.msra.mxu1 %v83_v56  ;;  %188 = vmatpush.msra.mxu2 %v99_v57 }
  0x24   :  { %211 = vmatpush.msra.mxu3 %v115_v58  ;;  %143 = vmatpush.msra.mxu0 %v66_v59 }
  0x25   :  { %166 = vmatpush.msra.mxu1 %v82_v60  ;;  %189 = vmatpush.msra.mxu2 %v98_v61 }
  0x26   :  { %212 = vmatpush.msra.mxu3 %v114_v62  ;;  %144 = vmatpush.msra.mxu0 %v65_v63 }
  0x27   :  { %167 = vmatpush.msra.mxu1 %v81_v0  ;;  %190 = vmatpush.msra.mxu2 %v97_v1 }
  0x28   :  { %213 = vmatpush.msra.mxu3 %v113_v2 }
  0x7a   :  { %v37_v8 = vpop.permute.xlu0 %36 }
  0x7b   :  { %vm41_vm0 = vcmp.eq.s32.totalorder %v31_v4, %v37_v8  ;;  %vm42_vm1 = vcmp.eq.s32.totalorder %v32_v5, %v37_v8  ;;  %vm43_vm2 = vcmp.eq.s32.totalorder %v33_v6, %v37_v8  ;;  %vm44_vm3 = vcmp.eq.s32.totalorder %v34_v7, %v37_v8 }
  0x7c   :  { %252 = vmatmul.msk.f32.vlgmr.msra.gmra.mxu0 %vm41_vm0, %v327_v9  ;;  %254 = vmatmul.msk.f32.vlgmr.msra.gmra.mxu1 %vm42_vm1, %v327_v9 }
  0x7d   :  { %256 = vmatmul.msk.f32.vlgmr.msra.gmra.mxu2 %vm43_vm2, %v327_v9  ;;  %258 = vmatmul.msk.f32.vlgmr.msra.gmra.mxu3 %vm44_vm3, %v327_v9 }
  0x82   :  { %v40_v10 = vpop.permute.xlu0 %39 }
  0x83   :  { %vm45_vm4 = vcmp.eq.s32.totalorder %v31_v4, %v40_v10  ;;  %vm46_vm5 = vcmp.eq.s32.totalorder %v32_v5, %v40_v10  ;;  %vm47_vm6 = vcmp.eq.s32.totalorder %v33_v6, %v40_v10  ;;  %vm48_vm7 = vcmp.eq.s32.totalorder %v34_v7, %v40_v10 }
  0x84   :  { %253 = vmatmul.msk.f32.gmra.mxu0 %vm45_vm4, %v327_v9  ;;  %255 = vmatmul.msk.f32.gmra.mxu1 %vm46_vm5, %v327_v9 }
  0x85   :  { %257 = vmatmul.msk.f32.gmra.mxu2 %vm47_vm6, %v327_v9  ;;  %259 = vmatmul.msk.f32.gmra.mxu3 %vm48_vm7, %v327_v9 }
  0xf9   :  { %v146_v11 = vpop.f32.mrf.mxu0  ;;  %v169_v12 = vpop.f32.mrf.mxu1 }
  0xfa   :  { %v170_v13 = vadd.f32 %v169_v12, %v146_v11 }
 0x100   :  { %v192_v14 = vpop.f32.mrf.mxu2  ;;  %v215_v15 = vpop.f32.mrf.mxu3 }
 0x101   :  { %v193_v16 = vadd.f32 %v192_v14, %v170_v13  ;;  %v149_v18 = vpop.f32.mrf.mxu0  ;;  %v172_v19 = vpop.f32.mrf.mxu1 }
 0x102   :  { %v173_v20 = vadd.f32 %v172_v19, %v149_v18 }
 0x103   :  { %v216_v17 = vadd.f32 %v215_v15, %v193_v16 }
 0x105   :  { %267 = vtanh.f32 %v216_v17 }
 0x108   :  { %v195_v21 = vpop.f32.mrf.mxu2  ;;  %v218_v23 = vpop.f32.mrf.mxu3 }
 0x109   :  { %v196_v22 = vadd.f32 %v195_v21, %v173_v20 }
 0x10b   :  { %v268_v24 = vpop.eup %267  ;;  %v219_v25 = vadd.f32 %v218_v23, %v196_v22 }
 0x10c   :  { %223 = vst [vmem:[#allocation5] sm:$0xff] %v268_v24 }
 0x10d   :  { %269 = vtanh.f32 %v219_v25 }
 0x113   :  { %v270_v26 = vpop.eup %269 }
 0x114   :  { %224 = vst [vmem:[#allocation5 + $0x8] sm:$0xff] %v270_v26 }
 0x115   :  { %237 = dma.vmem_to_hbm [thread:$0]  %s230_s19, 256, %s232_s22, [#allocation4], %s324_s14, %s324_s14, %s325_s15  }
 0x116   :  { %321 = dma.done.wait [#allocation4], 256  }
 0x117   :  { %322 = vsyncadd [#allocation4], 4294967040 }
 0x118   :  { %242 = vsyncpa [#allocation3], 1 }
 0x119   :  { %243 = vsyncpa [#allocation4], 1 }

</bundles_post_ra>
